<compile_context>
chip_gen: v7x
topology: tpu7x:2x2x1
jax: 0.10.0
libtpu: 0.0.40
codegen_flags: <defaults>
</compile_context>

<pallas_src>
import functools

import jax
import jax.numpy as jnp
import numpy as np
from jax.experimental import pallas as pl
from jax.experimental.pallas import tpu as pltpu

_LANE = 128
_SUB = 8
_MAX_BATCH_PER_BLOCK = 8      # bounds the static unroll in the fused kernel


def _round_up(x, m):
    return (x + m - 1) // m * m


def _vmem_limit_bytes():
    """Scoped-VMEM window: 64 MiB on 128-MiB parts (v5e/v6e), 32 MiB on v7x."""
    try:
        cap = pltpu.get_tpu_info().vmem_capacity_bytes
    except Exception:                      # conservative fallback
        return 32 * 1024 * 1024
    return 64 * 1024 * 1024 if cap >= 100 * 1024 * 1024 else 32 * 1024 * 1024


# --------------------------------------------------------------------------
# Path A: fused single-pass kernel (means + gating MLP + weighted sum), one
# HBM read of x per element.
# --------------------------------------------------------------------------
def _fused_attention_kernel(x_ref, w1t_ref, b1_ref, w2_ref, o_ref):
    # x_ref : (Bb, 2, C2, HW)  one group of whole batches, both channel halves
    # w1t   : (HW, 128) resident across the grid; b1_ref/w2_ref: (1, 128)
    # o_ref : (Bb, C2, HW)
    w1t = w1t_ref[...]
    b1 = b1_ref[...]
    w2 = w2_ref[...]
    bb = o_ref.shape[0]
    for b in range(bb):                       # tiny static unroll (bb <= 8)
        x0 = x_ref[b, 0]                      # (C2, HW) first channel half
        x1 = x_ref[b, 1]                      # (C2, HW) second channel half
        # Channel-half means (bag features), computed on the VMEM-resident block.
        bag0 = jnp.mean(x0, axis=0, keepdims=True).astype(jnp.float32)   # (1, HW)
        bag1 = jnp.mean(x1, axis=0, keepdims=True).astype(jnp.float32)   # (1, HW)
        # Linear(HW,128) + tanh on the MXU/EUP; Linear(128,1) as a VPU lane-reduce.
        h0 = jnp.tanh(jnp.dot(bag0, w1t, preferred_element_type=jnp.float32) + b1)
        h1 = jnp.tanh(jnp.dot(bag1, w1t, preferred_element_type=jnp.float32) + b1)
        s0 = jnp.sum(h0 * w2, axis=-1, keepdims=True)                    # (1, 1)
        s1 = jnp.sum(h1 * w2, axis=-1, keepdims=True)                    # (1, 1)
        # 2-way softmax == sigmoid of the logit difference (shared bias b2 cancels).
        g0 = 1.0 / (1.0 + jnp.exp(s1 - s0))                              # (1, 1)
        g1 = 1.0 - g0
        o_ref[b] = (x0 * g0 + x1 * g1).astype(o_ref.dtype)


# --------------------------------------------------------------------------
# Path B (fallback for batches that do not fit VMEM): two passes.
# --------------------------------------------------------------------------
def _gating_kernel(bag_ref, w1t_ref, b1_ref, w2_ref, gates_ref, acc_ref):
    # bag_ref : (2B, tk) K-tile (rows [0,B)=first-half means, [B,2B)=second-half)
    # w1t_ref : (tk, 128)        acc_ref: (2B, 128) VMEM accumulator
    # gates_ref: (B, 2) output, written on the last K step only
    k = pl.program_id(0)

    @pl.when(k == 0)
    def _init():
        acc_ref[...] = jnp.zeros_like(acc_ref)

    acc_ref[...] += jnp.dot(bag_ref[...], w1t_ref[...],
                            preferred_element_type=jnp.float32)

    @pl.when(k == pl.num_programs(0) - 1)
    def _finalize():
        nb = gates_ref.shape[0]
        h = jnp.tanh(acc_ref[...] + b1_ref[...])                     # (2B, 128)
        s = jnp.sum(h * w2_ref[...], axis=-1, keepdims=True)         # (2B, 1)
        # 2-way softmax == sigmoid of the logit difference; shared b2 cancels.
        g0 = 1.0 / (1.0 + jnp.exp(s[nb:] - s[:nb]))                  # (B, 1)
        gates_ref[:, 0:1] = g0
        gates_ref[:, 1:2] = 1.0 - g0


def _weighted_sum_kernel(gates_ref, x_ref, o_ref):
    # gates_ref: (2B,) f32 in SMEM (flat scalar prefetch: [2b]=g0_b, [2b+1]=g1_b)
    # x_ref    : (1, 2, Ct, HW)   o_ref: (1, Ct, HW)
    b = pl.program_id(0)
    g0 = gates_ref[2 * b]
    g1 = gates_ref[2 * b + 1]
    o_ref[0] = (x_ref[0, 0] * g0 + x_ref[0, 1] * g1).astype(o_ref.dtype)


# --------------------------------------------------------------------------
# Wrapper
# --------------------------------------------------------------------------
def attention_forward(x, w1, b1, w2, b2, *, force_two_pass=False):
    """x: (B, C, H, W) (C even). w1: (128, H*W), b1: (128,), w2: (1, 128), b2: (1,).
    Returns (B, C//2, H, W).

    b2 is accepted for API parity but unused: a bias shared by both logits
    cancels in the 2-way softmax."""
    del b2
    B, C, H, W = x.shape
    HW = H * W
    C2 = C // 2
    assert C == 2 * C2, "Attention requires an even channel count."
    assert w1.shape == (128, HW), "Linear(hw, 128) must match H*W."

    w1t = jnp.transpose(w1).astype(jnp.float32)          # (HW, 128)
    b1r = b1.reshape(1, 128).astype(jnp.float32)
    w2r = w2.reshape(1, 128).astype(jnp.float32)

    x5 = x.reshape(B, 2, C2, HW)                         # metadata-only view

    vmem_limit = _vmem_limit_bytes()
    c2p = _round_up(C2, _SUB)
    hwp = _round_up(HW, _LANE)
    w1t_bytes = _round_up(HW, _SUB) * 128 * 4
    # Per-batch double-buffered working set of the fused kernel:
    #   x block (2 halves) x2 buffers + out block x2 buffers, f32.
    per_batch_bytes = 6 * c2p * hwp * 4
    budget = vmem_limit - 2 * w1t_bytes - (4 << 20)      # headroom for b1/w2/internal

    # ------------------- Path A: fused single-pass --------------------------
    if (not force_two_pass) and budget > 0 and per_batch_bytes <= budget:
        bb = min(B, _MAX_BATCH_PER_BLOCK,
                 max(1, B // 2),                         # >=2 grid points for megacore
                 max(1, budget // per_batch_bytes))
        while B % bb:
            bb -= 1
        out = pl.pallas_call(
            _fused_attention_kernel,
            out_shape=jax.ShapeDtypeStruct((B, C2, HW), x.dtype),
            grid=(B // bb,),
            in_specs=[
                pl.BlockSpec((bb, 2, C2, HW), lambda i: (i, 0, 0, 0)),
                pl.BlockSpec((HW, 128), lambda i: (0, 0)),   # resident weights
                pl.BlockSpec((1, 128), lambda i: (0, 0)),
                pl.BlockSpec((1, 128), lambda i: (0, 0)),
            ],
            out_specs=pl.BlockSpec((bb, C2, HW), lambda i: (i, 0, 0)),
            compiler_params=pltpu.CompilerParams(
                dimension_semantics=("parallel",),
                vmem_limit_bytes=vmem_limit,
            ),
        )(x5, w1t, b1r, w2r)
        return out.reshape(B, C2, H, W)

    # ------------------- Path B: two-pass fallback ---------------------------
    # Pass 1a: channel-half means (one XLA read of x, unavoidable in two-pass).
    bag = jnp.mean(x5.astype(jnp.float32), axis=2)                   # (B, 2, HW)
    bag_cat = jnp.concatenate([bag[:, 0], bag[:, 1]], axis=0)        # (2B, HW)

    # Pass 1b: gating MLP, K-tiled over HW so w1t never has to be fully resident.
    gate_budget = vmem_limit - (4 << 20)
    if HW % _LANE == 0:
        tk = min(HW, 2048)
        while tk > _LANE and 2 * 4 * tk * (2 * B + 128) > gate_budget:
            tk -= _LANE
        while HW % tk:
            tk -= _LANE
    else:
        # TODO(synk): K-tile non-128-multiple HW (Element-indexed remainder block).
        tk = HW
    n_k = HW // tk

    gates = pl.pallas_call(
        _gating_kernel,
        out_shape=jax.ShapeDtypeStruct((B, 2), jnp.float32),
        grid=(n_k,),
        in_specs=[
            pl.BlockSpec((2 * B, tk), lambda k: (0, k)),
            pl.BlockSpec((tk, 128), lambda k: (k, 0)),
            pl.BlockSpec((1, 128), lambda k: (0, 0)),
            pl.BlockSpec((1, 128), lambda k: (0, 0)),
        ],
        out_specs=pl.BlockSpec((B, 2), lambda k: (0, 0)),
        scratch_shapes=[pltpu.VMEM((2 * B, 128), jnp.float32)],
        compiler_params=pltpu.CompilerParams(
            dimension_semantics=("arbitrary",),
            vmem_limit_bytes=vmem_limit,
        ),
    )(bag_cat, w1t, b1r, w2r)

    # Flat 1-D SMEM prefetch: avoids the [B,2] -> [ceil(B/8)*8,128]-word padding.
    gates_flat = gates.reshape(2 * B)

    # Pass 2: streaming weighted half-sum, tiled over (batch, channel rows).
    stream_budget = vmem_limit - (4 << 20)
    if C2 % _SUB == 0:
        ct = min(C2, max(_SUB, (stream_budget // (24 * hwp)) // _SUB * _SUB))
        while C2 % ct:
            ct -= _SUB
    else:
        # TODO(synk): channel halves not divisible by 8 keep the whole half resident.
        ct = C2

    out = pl.pallas_call(
        _weighted_sum_kernel,
        out_shape=jax.ShapeDtypeStruct((B, C2, HW), x.dtype),
        grid_spec=pltpu.PrefetchScalarGridSpec(
            num_scalar_prefetch=1,                         # gates -> SMEM
            grid=(B, C2 // ct),
            in_specs=[
                pl.BlockSpec((1, 2, ct, HW), lambda b, c, g: (b, 0, c, 0)),
            ],
            out_specs=pl.BlockSpec((1, ct, HW), lambda b, c, g: (b, c, 0)),
        ),
        compiler_params=pltpu.CompilerParams(
            dimension_semantics=("parallel", "parallel"),
            vmem_limit_bytes=vmem_limit,
        ),
    )(gates_flat, x5)

    return out.reshape(B, C2, H, W)


def _reference(x, w1, b1, w2, b2):
    # Pure-JAX reference matching the PyTorch module (keeps b2 + real softmax
    # to validate the in-kernel sigmoid / dropped-b2 rewrite).
    B, C, H, W = x.shape
    C2 = C // 2
    i1 = jnp.mean(x[:, :C2], axis=1)
    i2 = jnp.mean(x[:, C2:], axis=1)
    bag = jnp.stack([i1, i2], axis=1).reshape(B, 2, H * W)
    h = jnp.tanh(bag @ w1.T + b1)
    s = (h @ w2.T + b2).squeeze(-1)
    wgt = jax.nn.softmax(s, axis=1)
    wa = wgt[:, 0][:, None, None, None]
    wb = wgt[:, 1][:, None, None, None]
    return x[:, :C2] * wa + x[:, C2:] * wb


if __name__ == "__main__":
    # Small shapes consistent with the module: hw = H*W must match Linear(hw, 128).
    B, C, H, W = 2, 4, 16, 16
    HW = H * W

    key = jax.random.PRNGKey(0)
    kx, kw1, kb1, kw2, kb2 = jax.random.split(key, 5)

    x = jax.random.normal(kx, (B, C, H, W), dtype=jnp.float32)

    # Deterministic parameter init mimicking nn.Linear (uniform +/- 1/sqrt(fan_in)).
    lim1 = 1.0 / np.sqrt(HW)
    w1 = jax.random.uniform(kw1, (128, HW), jnp.float32, -lim1, lim1)
    b1 = jax.random.uniform(kb1, (128,), jnp.float32, -lim1, lim1)
    lim2 = 1.0 / np.sqrt(128)
    w2 = jax.random.uniform(kw2, (1, 128), jnp.float32, -lim2, lim2)
    b2 = jax.random.uniform(kb2, (1,), jnp.float32, -lim2, lim2)

    ref = _reference(x, w1, b1, w2, b2)

    # Primary fused single-pass path.
    out = jax.block_until_ready(attention_forward(x, w1, b1, w2, b2))
    np.testing.assert_allclose(np.asarray(out), np.asarray(ref),
                               rtol=1e-4, atol=1e-5)

    # Also exercise the large-shape two-pass fallback path at the small shape.
    out2 = jax.block_until_ready(
        attention_forward(x, w1, b1, w2, b2, force_two_pass=True))
    np.testing.assert_allclose(np.asarray(out2), np.asarray(ref),
                               rtol=1e-4, atol=1e-5)

    print("KERNEL_OK")
</pallas_src>

<mosaic_0001>
module attributes {stable_mosaic.version = 11 : i64} {
  func.func @_fused_attention_kernel(%arg0: i32, %arg1: memref<1x2x2x256xf32, #tpu.memory_space<vmem>>, %arg2: memref<256x128xf32, #tpu.memory_space<vmem>>, %arg3: memref<1x128xf32, #tpu.memory_space<vmem>>, %arg4: memref<1x128xf32, #tpu.memory_space<vmem>>, %arg5: memref<1x2x256xf32, #tpu.memory_space<vmem>>) attributes {dimension_semantics = [#tpu.dimension_semantics<parallel>], iteration_bounds = array<i64: 2>, scalar_prefetch = 0 : i64, scratch_operands = 0 : i64, tpu.core_type = #tpu.core_type<tc>, window_params = [{transform_indices = @transform_0, window_bounds = array<i64: 1, 2, 2, 256>}, {pipeline_mode = #tpu.pipeline_mode<synchronous>, transform_indices = @transform_1, window_bounds = array<i64: 256, 128>}, {pipeline_mode = #tpu.pipeline_mode<synchronous>, transform_indices = @transform_2, window_bounds = array<i64: 1, 128>}, {pipeline_mode = #tpu.pipeline_mode<synchronous>, transform_indices = @transform_3, window_bounds = array<i64: 1, 128>}, {transform_indices = @transform_4, window_bounds = array<i64: 1, 2, 256>}]} {
    %c0 = arith.constant 0 : index
    %c0_0 = arith.constant 0 : index
    %0 = vector.load %arg2[%c0, %c0_0] : memref<256x128xf32, #tpu.memory_space<vmem>>, vector<256x128xf32>
    %c0_1 = arith.constant 0 : index
    %c0_2 = arith.constant 0 : index
    %1 = vector.load %arg3[%c0_1, %c0_2] : memref<1x128xf32, #tpu.memory_space<vmem>>, vector<1x128xf32>
    %c0_3 = arith.constant 0 : index
    %c0_4 = arith.constant 0 : index
    %2 = vector.load %arg4[%c0_3, %c0_4] : memref<1x128xf32, #tpu.memory_space<vmem>>, vector<1x128xf32>
    %c0_5 = arith.constant 0 : index
    %c0_6 = arith.constant 0 : index
    %c0_7 = arith.constant 0 : index
    %c0_8 = arith.constant 0 : index
    %3 = vector.load %arg1[%c0_5, %c0_6, %c0_7, %c0_8] : memref<1x2x2x256xf32, #tpu.memory_space<vmem>>, vector<1x1x2x256xf32>
    %4 = vector.shape_cast %3 : vector<1x1x2x256xf32> to vector<2x256xf32>
    %c0_9 = arith.constant 0 : index
    %c1 = arith.constant 1 : index
    %c0_10 = arith.constant 0 : index
    %c0_11 = arith.constant 0 : index
    %5 = vector.load %arg1[%c0_9, %c1, %c0_10, %c0_11] : memref<1x2x2x256xf32, #tpu.memory_space<vmem>>, vector<1x1x2x256xf32>
    %6 = vector.shape_cast %5 : vector<1x1x2x256xf32> to vector<2x256xf32>
    %cst = arith.constant dense<0.000000e+00> : vector<256xf32>
    %7 = vector.multi_reduction <add>, %4, %cst [0] : vector<2x256xf32> to vector<256xf32>
    %8 = vector.shape_cast %7 : vector<256xf32> to vector<1x256xf32>
    %cst_12 = arith.constant 2.000000e+00 : f32
    %9 = vector.broadcast %cst_12 : f32 to vector<1x256xf32>
    %10 = arith.divf %8, %9 : vector<1x256xf32>
    %cst_13 = arith.constant dense<0.000000e+00> : vector<256xf32>
    %11 = vector.multi_reduction <add>, %6, %cst_13 [0] : vector<2x256xf32> to vector<256xf32>
    %12 = vector.shape_cast %11 : vector<256xf32> to vector<1x256xf32>
    %cst_14 = arith.constant 2.000000e+00 : f32
    %13 = vector.broadcast %cst_14 : f32 to vector<1x256xf32>
    %14 = arith.divf %12, %13 : vector<1x256xf32>
    %cst_15 = arith.constant dense<0.000000e+00> : vector<1x128xf32>
    %15 = tpu.matmul %10, %0, %cst_15 {dimension_numbers = #tpu.dot_dimension_numbers<[1], [0], [0], [1], [0, 0, 1, 1], [], []>} : vector<1x256xf32>, vector<256x128xf32>, vector<1x128xf32> -> vector<1x128xf32>
    %16 = arith.addf %15, %1 : vector<1x128xf32>
    %17 = math.tanh %16 : vector<1x128xf32>
    %cst_16 = arith.constant dense<0.000000e+00> : vector<1x128xf32>
    %18 = tpu.matmul %14, %0, %cst_16 {dimension_numbers = #tpu.dot_dimension_numbers<[1], [0], [0], [1], [0, 0, 1, 1], [], []>} : vector<1x256xf32>, vector<256x128xf32>, vector<1x128xf32> -> vector<1x128xf32>
    %19 = arith.addf %18, %1 : vector<1x128xf32>
    %20 = math.tanh %19 : vector<1x128xf32>
    %21 = arith.mulf %17, %2 : vector<1x128xf32>
    %cst_17 = arith.constant dense<0.000000e+00> : vector<1xf32>
    %22 = vector.multi_reduction <add>, %21, %cst_17 [1] : vector<1x128xf32> to vector<1xf32>
    %23 = vector.shape_cast %22 : vector<1xf32> to vector<1x1xf32>
    %24 = arith.mulf %20, %2 : vector<1x128xf32>
    %cst_18 = arith.constant dense<0.000000e+00> : vector<1xf32>
    %25 = vector.multi_reduction <add>, %24, %cst_18 [1] : vector<1x128xf32> to vector<1xf32>
    %26 = vector.shape_cast %25 : vector<1xf32> to vector<1x1xf32>
    %27 = arith.subf %26, %23 : vector<1x1xf32>
    %28 = math.exp %27 : vector<1x1xf32>
    %cst_19 = arith.constant 1.000000e+00 : f32
    %29 = vector.broadcast %cst_19 : f32 to vector<1x1xf32>
    %30 = arith.addf %29, %28 : vector<1x1xf32>
    %cst_20 = arith.constant 1.000000e+00 : f32
    %31 = vector.broadcast %cst_20 : f32 to vector<1x1xf32>
    %32 = arith.divf %31, %30 : vector<1x1xf32>
    %cst_21 = arith.constant 1.000000e+00 : f32
    %33 = vector.broadcast %cst_21 : f32 to vector<1x1xf32>
    %34 = arith.subf %33, %32 : vector<1x1xf32>
    %35 = vector.broadcast %32 : vector<1x1xf32> to vector<2x256xf32>
    %36 = arith.mulf %4, %35 : vector<2x256xf32>
    %37 = vector.broadcast %34 : vector<1x1xf32> to vector<2x256xf32>
    %38 = arith.mulf %6, %37 : vector<2x256xf32>
    %39 = arith.addf %36, %38 : vector<2x256xf32>
    %c0_22 = arith.constant 0 : index
    %c0_23 = arith.constant 0 : index
    %c0_24 = arith.constant 0 : index
    %40 = vector.load %arg5[%c0_22, %c0_23, %c0_24] : memref<1x2x256xf32, #tpu.memory_space<vmem>>, vector<1x2x256xf32>
    %41 = vector.shape_cast %40 : vector<1x2x256xf32> to vector<2x256xf32>
    %42 = vector.shape_cast %39 : vector<2x256xf32> to vector<1x2x256xf32>
    tpu.vector_store %arg5[%c0_22, %c0_23, %c0_24], %42 {strides = array<i32>} : memref<1x2x256xf32, #tpu.memory_space<vmem>>, vector<1x2x256xf32>,
    return
  }
  func.func @transform_0(%arg0: i32) -> (i32, i32, i32, i32) {
    %c0_i32 = arith.constant 0 : i32
    %c0_i32_0 = arith.constant 0 : i32
    %c0_i32_1 = arith.constant 0 : i32
    %c0_i32_2 = arith.constant 0 : i32
    return %arg0, %c0_i32, %c0_i32_0, %c0_i32_1 : i32, i32, i32, i32
  }
  func.func @transform_1(%arg0: i32) -> (i32, i32) {
    %c0_i32 = arith.constant 0 : i32
    %c0_i32_0 = arith.constant 0 : i32
    %c0_i32_1 = arith.constant 0 : i32
    return %c0_i32, %c0_i32_0 : i32, i32
  }
  func.func @transform_2(%arg0: i32) -> (i32, i32) {
    %c0_i32 = arith.constant 0 : i32
    %c0_i32_0 = arith.constant 0 : i32
    %c0_i32_1 = arith.constant 0 : i32
    return %c0_i32, %c0_i32_0 : i32, i32
  }
  func.func @transform_3(%arg0: i32) -> (i32, i32) {
    %c0_i32 = arith.constant 0 : i32
    %c0_i32_0 = arith.constant 0 : i32
    %c0_i32_1 = arith.constant 0 : i32
    return %c0_i32, %c0_i32_0 : i32, i32
  }
  func.func @transform_4(%arg0: i32) -> (i32, i32, i32) {
    %c0_i32 = arith.constant 0 : i32
    %c0_i32_0 = arith.constant 0 : i32
    %c0_i32_1 = arith.constant 0 : i32
    return %arg0, %c0_i32, %c0_i32_0 : i32, i32, i32
  }
}

</mosaic_0001>

<bundles_post_ra>
// kernel: tpu_custom_call.1
= control target key start
LH: loop header
LB: loop body
LE: loop exit
PB: predicated region body
PF: predicated region fallthrough
CT: control target
= control target key end

     0   :  { %9 = vsyncpa [#allocation3], 0  ;;  %s1201_s0 = inlined_call_operand.hbm [shape: f32[2,2,2,256], index: 0, kind: input, shape index: {}]   ;;  %s1202_s1 = inlined_call_operand.hbm [shape: f32[256,128], index: 1, kind: input, shape index: {}]   ;;  %s1203_s2 = inlined_call_operand.vmem [shape: f32[1,128], index: 2, kind: input, shape index: {}]   ;;  %s1204_s3 = inlined_call_operand.vmem [shape: f32[1,128], index: 3, kind: input, shape index: {}]   ;;  %s1205_s4 = inlined_call_operand.hbm [shape: f32[2,2,256], index: 4, kind: output, shape index: {}]  }
   0x1   :  { %11 = vsyncpa [#allocation3 + $0x1], 0 }
   0x2   :  { %12 = vsyncpa [#allocation6], 0 }
   0x3   :  { %13 = vsyncpa [#allocation4], 0 }
   0x4   :  { %15 = vsyncpa [#allocation4 + $0x1], 0  ;;  %s975_s15 = smov 0   ;;  %s977_s16 = smov 0  }
   0x5   :  { %s979_s17 = smov 0   ;;  %s981_s18 = smov 0  }
   0x6 LB: > { %s996_s19 = sadd.s32 4294967295, %s940_s18   ;;  %s589_s20 = sadd.s32 4294967294, %s940_s18   ;;  %s940_s18 = sphi %s981_s18, %s1225_s18   ;;  %s936_s17 = sphi %s979_s17, %s1224_s17   ;;  %s932_s16 = sphi %s977_s16, %s1223_s16   ;;  %s928_s15 = sphi %s975_s15, %s1222_s15  }
   0x7   : > { %p41_p0 = scmp.ne.s32.totalorder %s932_s16, %s928_s15  ;;  %p1206_p1 = scmp.eq.s32.totalorder %s996_s19, 0 }
   0x8   : > { %p134_p3 = scmp.eq.s32.totalorder %s589_s20, 1  ;;  %p590_p5 = scmp.ge.s32.totalorder %s940_s18, 1 }
   0x9   : > { %p1005_p4 = por %p1206_p1, %p41_p0  ;;  %p141_p7 = scmp.lt.s32.totalorder %s940_s18, 3 }
   0xa   : > { %p1010_p6 = por %p134_p3, %p41_p0  ;;  %s942_s24 = smov [#allocation5]  }
   0xb   : > { %s1209_s21 = scalar_select %p1005_p4, 1, 0 }
   0xc   : > { %s1210_s22 = scalar_select %p1010_p6, 1, 0 }
   0xd   : > { %p1015_p8 = pnand %p590_p5, %p141_p7  ;;  %s153_s25 = sshll.u32 %s942_s24, 4  ;;  %s1019_s25 = int_to_ptr.vmem [resolvable:$true] %s153_s25 }
   0xe   : > { %s1031_s27 = sadd.s32 1, %s940_s18   ;;  %s28_s28 = sadd.s32 1, %s936_s17 }
   0xf   : > { %s1211_s23 = scalar_select %p1015_p8, 1, 0 }
  0x10   : > { %p750_p9 = pneg %p1015_p8  ;;  %s25_s29 = ssub.s32 %s940_s18, %s1031_s27 }
  0x11   : > { %s812_s6 = scalar_lea.hbm %s1202_s1, 4096 }
  0x12   : > { %p1026_p11 = pnand %p750_p9, %p1206_p1  ;;  %p813_p12 = scmp.ne.s32.totalorder %s1202_s1, %s812_s6 }
  0x13   : > { %p819_p5 = scmp.lt.u32.totalorder %s812_s6, %s1202_s1 }
  0x14   : > { %p814_p13 = pneg %p1026_p11 }
  0x16   : > { %p815_p0 = pnand %p814_p13, %p813_p12 }
  0x18   : > { %p816_p3 = pneg %p815_p0 }
  0x1a   : > { %p821_p7 = pnand %p819_p5, %p816_p3 }
  0x1c   : > { %824 = shalt.err (!%p821_p7)
}
  0x1d   : > { %s825_s11 = scalar_lea.vmem %s1019_s25, 4096  ;;  %p833_p2 = scmp.lt.s32.totalorder %s1019_s25, %s1019_s25 }
  0x1e   : > { %p826_p9 = scmp.ne.s32.totalorder %s1019_s25, %s825_s11  ;;  %p834_p6 = scmp.lt.s32.totalorder %s825_s11, %s825_s11 }
  0x20   : > { %p828_p10 = pnand %p826_p9, %p814_p13  ;;  %p835_p4 = por %p834_p6, %p833_p2 }
  0x22   : > { %p829_p1 = pneg %p828_p10 }
  0x24   : > { %p836_p8 = pnand %p835_p4, %p829_p1 }
  0x26   : > { %839 = shalt.err (!%p836_p8)
}
  0x27   : > { %s943_s12 = smov 128   ;;  %s944_s13 = smov 8  }
  0x28   : > { %753 = dma.hbm_to_vmem [thread:$0]  (!%p1026_p11), %s1202_s1, 4096, %s1019_s25, [#allocation6], %s943_s12, %s943_s12, %s944_s13  }
  0x29   : > { %p26_p2 = scmp.eq.s32.totalorder %s25_s29, 0  ;;  %p35_p1 = scmp.ne.s32.totalorder %s936_s17, %s932_s16 }
  0x2a   : > { %p36_p4 = scmp.eq.s32.totalorder %s940_s18, 0  ;;  %p763_p6 = scmp.lt.s32.totalorder %s940_s18, 2 }
  0x2b   : > { %s1062_s24 = scalar_select %p26_p2, %s936_s17, %s28_s28  }
  0x2c   : > { %p37_p8 = por %p36_p4, %p35_p1  ;;  %p1213_p10 = scmp.eq.s32.totalorder %s996_s19, 1 }
  0x2d   : > { %s173_s5 = sand.u32 1, %s936_s17   ;;  %s606_s6 = sshll.u32 %s940_s18, 7 }
  0x2e   : > { %p1066_p12 = por %p1213_p10, %p35_p1  ;;  %s593_s7 = sshll.u32 %s173_s5, 3 }
  0x2f   : > { %s1075_s9 = scalar_lea.hbm %s1201_s0, %s606_s6  ;;  %s177_s25 = scalar_lea.vmem [#allocation2], %s593_s7 }
  0x30   : > { %s184_s28 = sshll.u32 %s177_s25, 4  ;;  %p1077_p11 = pnand %p763_p6, %p37_p8  ;;  %s1081_s28 = int_to_ptr.vmem [resolvable:$true] %s184_s28 }
  0x31   : > { %s1083_s10 = scalar_lea.sflag [#allocation3], %s173_s5  ;;  %s840_s11 = scalar_lea.hbm %s1075_s9, 128 }
  0x32   : > { %p841_p13 = scmp.ne.s32.totalorder %s1075_s9, %s840_s11  ;;  %p842_p0 = pneg %p1077_p11 }
  0x33   : > { %s845_s14 = scalar_lea.hbm %s1201_s0, 256  ;;  %p846_p7 = scmp.lt.u32.totalorder %s1075_s9, %s1201_s0 }
  0x34   : > { %p843_p3 = pnand %p842_p0, %p841_p13  ;;  %p847_p9 = scmp.lt.u32.totalorder %s845_s14, %s840_s11 }
  0x35   : > { %p849_p1 = scmp.lt.u32.totalorder %s840_s11, %s1075_s9 }
  0x36   : > { %p844_p5 = pneg %p843_p3  ;;  %p848_p2 = por %p847_p9, %p846_p7 }
  0x38   : > { %p850_p4 = por %p849_p1, %p848_p2 }
  0x3a   : > { %p851_p6 = pnand %p850_p4, %p844_p5 }
  0x3c   : > { %854 = shalt.err (!%p851_p6)
}
  0x3d   : > { %s855_s5 = scalar_lea.vmem %s1081_s28, 128  ;;  %s945_s7 = smov [#allocation2]  }
  0x3e   : > { %p856_p8 = scmp.ne.s32.totalorder %s1081_s28, %s855_s5  ;;  %s860_s26 = sshll.u32 %s945_s7, 4  ;;  %s861_s26 = int_to_ptr.vmem [resolvable:$false] %s860_s26 }
  0x3f   : > { %s862_s8 = scalar_lea.vmem %s861_s26, 256  ;;  %p863_p3 = scmp.lt.s32.totalorder %s1081_s28, %s861_s26 }
  0x40   : > { %p858_p10 = pnand %p856_p8, %p842_p0  ;;  %p864_p7 = scmp.lt.s32.totalorder %s862_s8, %s855_s5 }
  0x42   : > { %p859_p13 = pneg %p858_p10  ;;  %p865_p9 = por %p864_p7, %p863_p3 }
  0x44   : > { %p866_p2 = pnand %p865_p9, %p859_p13 }
  0x46   : > { %869 = shalt.err (!%p866_p2)
}
  0x47   : > { %s946_s25 = smov 64   ;;  %s947_s11 = smov 4  }
  0x48   : > { %757 = dma.hbm_to_vmem [thread:$0]  (!%p1077_p11), %s1075_s9, 128, %s1081_s28, %s1083_s10, %s946_s25, %s946_s25, %s947_s11  }
  0x49   : > { %p1216_p0 = scmp.ne.s32.totalorder %s1211_s23, 0 }
  0x4a   : > { %s1114_s12 = sand.u32 (!%p1216_p0), 1, %s932_s16   ;;  %p1217_p5 = scmp.ne.s32.totalorder (!%p1216_p0), %s1209_s21, 0 }
  0x4b   : > { %196 = sbr.rel (%p1216_p0) target bundleno = 548 (0x224), region = 36  ;;  %s597_s13 = sshll.u32 (!%p1216_p0), %s1114_s12, 3 }
  0x4c   : > { %s199_s14 = scalar_lea.sflag (!%p1216_p0), [#allocation3], %s1114_s12  ;;  %s1118_s20 = scalar_lea.vmem (!%p1216_p0), [#allocation2], %s597_s13 }
  0x52   : > { %915 = dma.done.wait (%p1217_p5), %s199_s14, 128  }
  0x53   : > { %917 = vsyncadd (%p1217_p5), %s199_s14, 4294967168  ;;  %p1218_p11 = scmp.eq.s32.totalorder %s996_s19, 0 }
  0x55   : > { %919 = dma.done.wait (%p1218_p11), [#allocation6], 4096   ;;  %p1219_p1 = pmov %p1218_p11 }
  0x56   : > { %v948_v0 = vmov 1983009808   ;;  %v272_v2 = vlaneseq  ;;  %v247_v3 = vld [vmem:[#allocation5 + $0x80] sm:$0xff]  ;;  %v248_v4 = vld [vmem:[#allocation5 + $0x88] sm:$0xff]  ;;  %v249_v8 = vld [vmem:[#allocation5 + $0x90] sm:$0xff]  ;;  %vm279_vm0 = vcmask 1041408  }
  0x57   : > { %921 = vsyncadd (%p1219_p1), [#allocation6], 4294963200  ;;  %v270_v1 = vunpack.c.l.s4 %v948_v0  ;;  %v231_v5 = vld [vmem:[#allocation5] sm:$0xff]  ;;  %v678_v6 = vpack.c.bf16 %v248_v4, %v247_v3  ;;  %v232_v7 = vld [vmem:[#allocation5 + $0x8] sm:$0xff]  ;;  %vm467_vm1 = vcmask 1040384   ;;  %s599_s29 = sshll.u32 %s1114_s12, 2 }
  0x58   : > { %v250_v9 = vld [vmem:[#allocation5 + $0x98] sm:$0xff]  ;;  %v680_v10 = vpack.c.bf16 %v232_v7, %v231_v5  ;;  %v233_v12 = vld [vmem:[#allocation5 + $0x10] sm:$0xff]  ;;  %v251_v14 = vld [vmem:[#allocation5 + $0xa0] sm:$0xff]  ;;  %v1128_v17 = vshrl.u32 %v272_v2, 7  ;;  %s607_s10 = sshll.u32 %s996_s19, 6  ;;  %s230_s6 = scalar_lea.vmem [#allocation7], %s599_s29 }
  0x59   : > { %v682_v11 = vpack.c.bf16 %v250_v9, %v249_v8  ;;  %v234_v13 = vld [vmem:[#allocation5 + $0x18] sm:$0xff]  ;;  %679 = vmatprep.subr.bf16.mxu0 %v678_v6  ;;  %711 = vmatprep.subr.bf16.mxu1 %v678_v6  ;;  %v252_v15 = vld [vmem:[#allocation5 + $0xa8] sm:$0xff]  ;;  %v271_v16 = vunpack.c.0.s8 %v270_v1  ;;  %v235_v20 = vld [vmem:[#allocation5 + $0x20] sm:$0xff]  ;;  %s509_s5 = sshll.u32 %s230_s6, 4  ;;  %s1157_s8 = scalar_lea.hbm %s1205_s4, %s607_s10  ;;  %s1159_s5 = int_to_ptr.vmem [resolvable:$true] %s509_s5 }
  0x5a   : > { %681 = vmatpush3.bf16.msra.mxu0 %v680_v10  ;;  %713 = vmatpush3.bf16.msra.mxu1 %v680_v10  ;;  %v684_v18 = vpack.c.bf16 %v234_v13, %v233_v12  ;;  %v686_v19 = vpack.c.bf16 %v252_v15, %v251_v14  ;;  %v236_v21 = vld [vmem:[#allocation5 + $0x28] sm:$0xff]  ;;  %v253_v22 = vld [vmem:[#allocation5 + $0xb0] sm:$0xff]  ;;  %v254_v23 = vld [vmem:[#allocation5 + $0xb8] sm:$0xff]  ;;  %s495_s25 = scalar_lea.sflag [#allocation4], %s1114_s12  ;;  %s870_s19 = scalar_lea.vmem %s1159_s5, 64 }
  0x5b   : > { %683 = vmatprep.subr.bf16.mxu0 %v682_v11  ;;  %715 = vmatprep.subr.bf16.mxu1 %v682_v11  ;;  %v274_v24 = vsub.s32 %v271_v16, %v1128_v17  ;;  %v688_v25 = vpack.c.bf16 %v236_v21, %v235_v20  ;;  %v690_v26 = vpack.c.bf16 %v254_v23, %v253_v22  ;;  %v237_v27 = vld [vmem:[#allocation5 + $0x30] sm:$0xff]  ;;  %v238_v28 = vld [vmem:[#allocation5 + $0x38] sm:$0xff]  ;;  %v255_v29 = vld [vmem:[#allocation5 + $0xc0] sm:$0xff]  ;;  %p871_p4 = scmp.ne.s32.totalorder %s1159_s5, %s870_s19  ;;  %s949_s11 = smov [#allocation7]  }
  0x5c   : > { %v256_v30 = vld [vmem:[#allocation5 + $0xc8] sm:$0xff]  ;;  %v1132_v31 = vld [vmem:[%s1118_s20] sm:$0xf]  ;;  %v1136_v33 = vld [vmem:[%s1118_s20 + $0x4] sm:$0xf]  ;;  %v692_v34 = vpack.c.bf16 %v238_v28, %v237_v27  ;;  %s874_s13 = sshll.u32 %s949_s11, 4  ;;  %s875_s13 = int_to_ptr.vmem [resolvable:$false] %s874_s13 }
  0x5d   : > { %v275_v32 = vrot.slane %v1132_v31, %v274_v24  ;;  %v304_v35 = vrot.slane %v1136_v33, %v274_v24  ;;  %v694_v36 = vpack.c.bf16 %v256_v30, %v255_v29  ;;  %v239_v37 = vld [vmem:[#allocation5 + $0x40] sm:$0xff]  ;;  %v240_v38 = vld [vmem:[#allocation5 + $0x48] sm:$0xff]  ;;  %v257_v41 = vld [vmem:[#allocation5 + $0xd0] sm:$0xff]  ;;  %p872_p6 = pnand %p871_p4, %p1066_p12  ;;  %s876_s14 = scalar_lea.vmem %s875_s13, 128 }
  0x5e   : > { %685 = vmatpush3.bf16.msra.mxu0 %v684_v18  ;;  %717 = vmatpush3.bf16.msra.mxu1 %v684_v18  ;;  %v258_v42 = vld [vmem:[#allocation5 + $0xd8] sm:$0xff]  ;;  %v696_v48 = vpack.c.bf16 %v240_v38, %v239_v37  ;;  %v241_v53 = vld [vmem:[#allocation5 + $0x50] sm:$0xff]  ;;  %v259_v57 = vld [vmem:[#allocation5 + $0xe0] sm:$0xff]  ;;  %p877_p10 = scmp.lt.s32.totalorder %s1159_s5, %s875_s13  ;;  %p878_p13 = scmp.lt.s32.totalorder %s876_s14, %s870_s19 }
  0x5f   : > { %687 = vmatprep.subr.bf16.mxu0 %v686_v19  ;;  %719 = vmatprep.subr.bf16.mxu1 %v686_v19  ;;  %v276_v39 = vcombine.high %v275_v32, %v275_v32  ;;  %v280_v40 = vsel %vm279_vm0, %v275_v32, 0.0  ;;  %v305_v44 = vcombine.high %v304_v35, %v304_v35  ;;  %v308_v45 = vsel %vm279_vm0, %v304_v35, 0.0  ;;  %v242_v54 = vld [vmem:[#allocation5 + $0x58] sm:$0xff]  ;;  %v260_v58 = vld [vmem:[#allocation5 + $0xe8] sm:$0xff]  ;;  %v243_v3 = vld [vmem:[#allocation5 + $0x60] sm:$0xff]  ;;  %p873_p8 = pneg %p872_p6 }
  0x60   : > { %v281_v43 = vrot.slane %v280_v40, 4  ;;  %v309_v47 = vrot.slane %v308_v45, 4  ;;  %v698_v52 = vpack.c.bf16 %v258_v42, %v257_v41  ;;  %v700_v63 = vpack.c.bf16 %v242_v54, %v241_v53  ;;  %v244_v4 = vld [vmem:[#allocation5 + $0x68] sm:$0xff]  ;;  %v261_v7 = vld [vmem:[#allocation5 + $0xf0] sm:$0xff]  ;;  %v262_v8 = vld [vmem:[#allocation5 + $0xf8] sm:$0xff]  ;;  %p879_p3 = por %p878_p13, %p877_p10 }
  0x61   : > { %v287_v46 = vsel %vm279_vm0, %v276_v39, 0.0  ;;  %v315_v51 = vsel %vm279_vm0, %v305_v44, 0.0  ;;  %v702_v2 = vpack.c.bf16 %v260_v58, %v259_v57  ;;  %v704_v13 = vpack.c.bf16 %v244_v4, %v243_v3  ;;  %v245_v16 = vld [vmem:[#allocation5 + $0x70] sm:$0xff]  ;;  %v246_v18 = vld [vmem:[#allocation5 + $0x78] sm:$0xff] }
  0x62   : > { %689 = vmatpush3.bf16.msra.mxu0 %v688_v25  ;;  %721 = vmatpush3.bf16.msra.mxu1 %v688_v25  ;;  %v288_v49 = vrot.slane %v287_v46, 4  ;;  %v282_v50 = vadd.f32 %v281_v43, %v280_v40  ;;  %v316_v55 = vrot.slane %v315_v51, 4  ;;  %v310_v56 = vadd.f32 %v309_v47, %v308_v45  ;;  %v263_v32 = vld [vmem:[%s1203_s2] sm:$0x1]  ;;  %p880_p7 = pnand %p879_p3, %p873_p8 }
  0x63   : > { %691 = vmatprep.subr.bf16.mxu0 %v690_v26  ;;  %723 = vmatprep.subr.bf16.mxu1 %v690_v26  ;;  %v706_v15 = vpack.c.bf16 %v262_v8, %v261_v7  ;;  %v708_v24 = vpack.c.bf16 %v246_v18, %v245_v16  ;;  %v264_v40 = vld [vmem:[%s1204_s3] sm:$0x1]  ;;  %v484_v53 = vsub.s32 0, %v1128_v17 }
  0x64   : > { %v289_v59 = vadd.f32 %v288_v49, %v287_v46  ;;  %v283_v60 = vrot.slane %v282_v50, 2  ;;  %v317_v61 = vadd.f32 %v316_v55, %v315_v51  ;;  %v311_v62 = vrot.slane %v310_v56, 2 }
  0x66   : > { %693 = vmatpush3.bf16.msra.mxu0 %v692_v34  ;;  %725 = vmatpush3.bf16.msra.mxu1 %v692_v34  ;;  %v290_v0 = vrot.slane %v289_v59, 2  ;;  %v284_v1 = vadd.f32 %v283_v60, %v282_v50  ;;  %v318_v5 = vrot.slane %v317_v61, 2  ;;  %v312_v6 = vadd.f32 %v311_v62, %v310_v56 }
  0x67   : > { %695 = vmatprep.subr.bf16.mxu0 %v694_v36  ;;  %727 = vmatprep.subr.bf16.mxu1 %v694_v36 }
  0x68   : > { %v291_v9 = vadd.f32 %v290_v0, %v289_v59  ;;  %v285_v10 = vrot.slane %v284_v1, 1  ;;  %v319_v11 = vadd.f32 %v318_v5, %v317_v61  ;;  %v313_v12 = vrot.slane %v312_v6, 1 }
  0x6a   : > { %697 = vmatpush3.bf16.msra.mxu0 %v696_v48  ;;  %729 = vmatpush3.bf16.msra.mxu1 %v696_v48  ;;  %v292_v14 = vrot.slane %v291_v9, 1  ;;  %v320_v19 = vrot.slane %v319_v11, 1  ;;  %v286_v21 = vadd.f32 %v285_v10, %v284_v1  ;;  %v314_v23 = vadd.f32 %v313_v12, %v312_v6 }
  0x6b   : > { %699 = vmatprep.subr.bf16.mxu0 %v698_v52  ;;  %731 = vmatprep.subr.bf16.mxu1 %v698_v52 }
  0x6c   : > { %v293_v20 = vadd.f32 %v292_v14, %v291_v9  ;;  %v321_v22 = vadd.f32 %v320_v19, %v319_v11  ;;  %v295_v27 = vmul.f32 0.5, %v286_v21  ;;  %v322_v28 = vmul.f32 0.5, %v314_v23 }
  0x6e   : > { %701 = vmatpush3.bf16.msra.mxu0 %v700_v63  ;;  %733 = vmatpush3.bf16.msra.mxu1 %v700_v63  ;;  %v296_v25 = vmul.f32 0.5, %v293_v20  ;;  %v323_v26 = vmul.f32 0.5, %v321_v22 }
  0x6f   : > { %703 = vmatprep.subr.bf16.mxu0 %v702_v2  ;;  %735 = vmatprep.subr.bf16.mxu1 %v702_v2 }
  0x70   : > { %388 = vmatprep.mubr.f32.mxu0 %v296_v25  ;;  %459 = vmatprep.mubr.f32.mxu1 %v323_v26 }
  0x72   : > { %705 = vmatpush3.bf16.msra.mxu0 %v704_v13  ;;  %737 = vmatpush3.bf16.msra.mxu1 %v704_v13 }
  0x73   : > { %707 = vmatprep.subr.bf16.mxu0 %v706_v15  ;;  %739 = vmatprep.subr.bf16.mxu1 %v706_v15 }
  0x76   : > { %709 = vmatpush3.bf16.msra.mxu0 %v708_v24  ;;  %741 = vmatpush3.bf16.msra.mxu1 %v708_v24 }
  0x79   : > { %389 = vmatmul.mubr.f32.vlgmr.msra.gmra.mrb[0].mxu0 %v295_v27  ;;  %460 = vmatmul.mubr.f32.vlgmr.msra.gmra.mrb[0].mxu1 %v322_v28 }
 0x14c   : > { %v640_v29 = vpop.f32.mrb[0].mxu0  ;;  %v675_v30 = vpop.f32.mrb[0].mxu1 }
 0x14d   : > { %v641_v34 = vpop.f32.mrb[1].mxu0  ;;  %v676_v35 = vpop.f32.mrb[1].mxu1 }
 0x14e   : > { %v642_v36 = vadd.f32 %v641_v34, %v640_v29  ;;  %v677_v37 = vadd.f32 %v676_v35, %v675_v30 }
 0x150   : > { %v391_v38 = vadd.f32 %v642_v36, %v263_v32  ;;  %v462_v39 = vadd.f32 %v677_v37, %v263_v32 }
 0x152   : > { %804 = vtanh.f32 %v391_v38 }
 0x153   : > { %806 = vtanh.f32 %v462_v39 }
 0x15c   : > { %v805_v41 = vpop.eup %804 }
 0x15d   : > { %v807_v42 = vpop.eup %806  ;;  %v466_v43 = vmul.f32 %v805_v41, %v264_v40 }
 0x15e   : > { %v471_v44 = vmul.f32 %v807_v42, %v264_v40 }
 0x15f   : > { %v468_v45 = vsel %vm467_vm1, %v466_v43, 0.0 }
 0x160   : > { %469 = vadd.xlane.f32.xlu0 %v468_v45  ;;  %v472_v46 = vsel %vm467_vm1, %v471_v44, 0.0 }
 0x164   : > { %473 = vadd.xlane.f32.xlu0 %v472_v46 }
 0x1ed   : > { %v470_v47 = vpop.xlane.xlu0 %469 }
 0x1f1   : > { %v474_v48 = vpop.xlane.xlu0 %473 }
 0x1f2   : > { %v475_v49 = vsub.f32 %v474_v48, %v470_v47 }
 0x1f4   : > { %v476_v50 = vmul.f32 1.442695, %v475_v49 }
 0x1f6   : > { %808 = vpow2.f32 %v476_v50 }
 0x200   : > { %v809_v51 = vpop.eup %808 }
 0x201   : > { %v478_v52 = vadd.f32 1.0, %v809_v51 }
 0x203   : > { %810 = vrcp.f32 %v478_v52 }
 0x20d   : > { %v811_v54 = vpop.eup %810 }
 0x20e   : > { %v481_v55 = vsub.f32 1.0, %v811_v54  ;;  %v485_v56 = vrot.slane %v811_v54, %v484_v53 }
 0x210   : > { %v490_v57 = vrot.slane %v481_v55, %v484_v53  ;;  %v486_v58 = vmul.f32 %v485_v56, %v1132_v31 }
 0x212   : > { %v491_v59 = vmul.f32 %v1136_v33, %v490_v57 }
 0x214   : > { %v492_v60 = vadd.f32 %v491_v59, %v486_v58 }
 0x216   : > { %493 = vst [vmem:[%s230_s6] sm:$0xf] %v492_v60 }
 0x217   : > { %883 = shalt.err (!%p880_p7)
}
 0x218   : > { %s884_s12 = scalar_lea.hbm %s1157_s8, 64  ;;  %s888_s23 = scalar_lea.hbm %s1205_s4, 128 }
 0x219   : > { %p885_p9 = scmp.ne.s32.totalorder %s1157_s8, %s884_s12  ;;  %p889_p5 = scmp.lt.u32.totalorder %s1157_s8, %s1205_s4 }
 0x21a   : > { %p890_p11 = scmp.lt.u32.totalorder %s888_s23, %s884_s12  ;;  %p892_p4 = scmp.lt.u32.totalorder %s884_s12, %s1157_s8 }
 0x21b   : > { %p886_p2 = pnand %p885_p9, %p1066_p12 }
 0x21c   : > { %p891_p1 = por %p890_p11, %p889_p5 }
 0x21d   : > { %p887_p0 = pneg %p886_p2 }
 0x21e   : > { %p893_p6 = por %p892_p4, %p891_p1 }
 0x220   : > { %p894_p8 = pnand %p893_p6, %p887_p0 }
 0x222   : > { %897 = shalt.err (!%p894_p8)
}
 0x223   : > { %748 = dma.vmem_to_hbm [thread:$0]  (%p1066_p12), %s1159_s5, 64, %s1157_s8, %s495_s25  }
 0x224 PF: > { %s521_s29 = sand.u32 1, %s928_s15   ;;  %p1220_p10 = scmp.ne.s32.totalorder %s1210_s22, 0 }
 0x225   : > { %p1221_p13 = scmp.ge.s32.totalorder %s940_s18, 2  ;;  %s522_s10 = scalar_lea.sflag [#allocation4], %s521_s29 }
 0x227   : > { %p759_p3 = pnand %p1221_p13, %p1220_p10 }
 0x229   : > { %923 = dma.done.wait (!%p759_p3), %s522_s10, 64  }
 0x22a   : > { %925 = vsyncadd (!%p759_p3), %s522_s10, 4294967232  ;;  %p18_p7 = scmp.ge.s32.totalorder %s1031_s27, 4   ;;  %s1222_s15 = smov %s932_s16 }
 0x22b   : > { %s1223_s16 = smov %s936_s17  ;;  %s1224_s17 = smov %s1062_s24 }
 0x22c   : > { %s1225_s18 = smov %s1031_s27  ;;  %20 = sbr.rel (!%p18_p7) target bundleno = 6 (0x6), region = 86 }
 0x233   :  { %527 = vsyncpa [#allocation3], 1 }
 0x234   :  { %529 = vsyncpa [#allocation3 + $0x1], 1 }
 0x235   :  { %530 = vsyncpa [#allocation6], 1 }
 0x236   :  { %531 = vsyncpa [#allocation4], 1 }
 0x237   :  { %533 = vsyncpa [#allocation4 + $0x1], 1 }

</bundles_post_ra>
